<compile_context>
chip_gen: v5e
topology: v5e:2x2
jax: 0.10.0
libtpu: 0.0.40
codegen_flags: <defaults>
</compile_context>

<pallas_src>
import jax
import jax.numpy as jnp
from jax.experimental import pallas as pl
from jax.experimental.pallas import tpu as pltpu


def rlinear_kernel(x_ref, w_ref, b_ref, o_ref):
    # x_ref: [S, TC]   (one batch element, a lane tile of channels)
    # w_ref: [P, S], b_ref: [P, 1], o_ref: [P, TC]
    x = x_ref[...]
    s = x.shape[0]

    # RevIN statistics over the seq axis (per channel column).
    # torch.std is unbiased (/(S-1)); eps is added AFTER sqrt (matches module).
    mean = jnp.mean(x, axis=0, keepdims=True)                    # [1, TC]
    centered = x - mean                                          # [S, TC]
    var = jnp.sum(centered * centered, axis=0, keepdims=True) * (1.0 / (s - 1))
    std = jnp.sqrt(var) + 1e-6                                   # [1, TC]

    # out = W @ (x - mean) + b * std + mean
    # (algebraically identical to normalize -> linear -> de-normalize,
    #  because std broadcasts over both the S and P axes of each column).
    pred = jnp.dot(w_ref[...], centered, preferred_element_type=jnp.float32)  # [P, TC]
    o_ref[...] = pred + b_ref[...] * std + mean


def _pick_c_tile(B, C, lane_tile):
    """Channel (lane) tile: 128-multiple divisor of C when possible, else full C."""
    if C % 128 != 0:
        return C  # full-dim block -> no padding; only the tail lanes are masked
    divisors = [d for d in range(128, C + 1, 128) if C % d == 0]
    fitting = [d for d in divisors if d <= lane_tile]
    tc = max(fitting) if fitting else min(divisors)
    if B == 1:
        # Keep at least 2 grid steps so v7x's two TensorCores both get work.
        two_step = [d for d in divisors if (C // d) >= 2 and d <= lane_tile]
        if two_step:
            tc = max(two_step)
    return tc


def rlinear_forward(x, weight, bias, *, lane_tile=512):
    """x: [B, S, C] f32, weight: [P, S] f32, bias: [P] f32 -> [B, P, C] f32."""
    B, S, C = x.shape
    P = weight.shape[0]
    assert S >= 2, "unbiased std requires seq_len >= 2 (matches torch.std semantics)"

    tc = _pick_c_tile(B, C, lane_tile)
    n_ct = C // tc
    bias2d = bias.reshape(P, 1)

    # VMEM footprint: double-buffered x/out tiles + resident weight/bias.
    vmem_need = 4 * (2 * S * tc + 2 * P * tc + P * S + 2 * P)
    vmem_limit = int(min(max(2 * vmem_need + (4 << 20), 32 << 20), 56 << 20))

    return pl.pallas_call(
        rlinear_kernel,
        out_shape=jax.ShapeDtypeStruct((B, P, C), jnp.float32),
        grid_spec=pl.GridSpec(
            grid=(B, n_ct),
            in_specs=[
                # x tile: batch dim squeezed, seq on sublanes, channel tile on lanes
                pl.BlockSpec((None, S, tc), lambda b, j: (b, 0, j)),
                pl.BlockSpec((P, S), lambda b, j: (0, 0)),   # weight (VMEM-resident)
                pl.BlockSpec((P, 1), lambda b, j: (0, 0)),   # bias   (VMEM-resident)
            ],
            out_specs=pl.BlockSpec((None, P, tc), lambda b, j: (b, 0, j)),
        ),
        compiler_params=pltpu.CompilerParams(
            dimension_semantics=("parallel", "parallel"),
            vmem_limit_bytes=vmem_limit,
        ),
    )(x, weight, bias2d)


def rlinear_reference(x, weight, bias):
    mean = jnp.mean(x, axis=1, keepdims=True)
    std = jnp.std(x, axis=1, keepdims=True, ddof=1) + 1e-6
    xn = (x - mean) / std
    pred = jnp.einsum("bsc,ps->bpc", xn, weight) + bias[None, :, None]
    return pred * std + mean


if __name__ == "__main__":
    # Small, deterministic config: batch=2, seq_len=16, pred_len=8, channels=32
    B, S, P, C = 2, 16, 8, 32
    key = jax.random.PRNGKey(0)
    kx, kw, kb = jax.random.split(key, 3)

    x = jax.random.normal(kx, (B, S, C), dtype=jnp.float32)
    # nn.Linear(seq_len, pred_len): weight [pred_len, seq_len], bias [pred_len]
    bound = 1.0 / jnp.sqrt(S)
    weight = jax.random.uniform(kw, (P, S), jnp.float32, -bound, bound)
    bias = jax.random.uniform(kb, (P,), jnp.float32, -bound, bound)

    out = jax.block_until_ready(rlinear_forward(x, weight, bias))

    ref = rlinear_reference(x, weight, bias)
    assert out.shape == (B, P, C)
    assert jnp.allclose(out, ref, atol=1e-4, rtol=1e-4), "mismatch vs reference"

    print("KERNEL_OK")
</pallas_src>

<mosaic_0001>
module attributes {stable_mosaic.version = 11 : i64} {
  func.func @rlinear_kernel(%arg0: i32, %arg1: i32, %arg2: memref<1x16x32xf32, #tpu.memory_space<vmem>>, %arg3: memref<8x16xf32, #tpu.memory_space<vmem>>, %arg4: memref<8x1xf32, #tpu.memory_space<vmem>>, %arg5: memref<1x8x32xf32, #tpu.memory_space<vmem>>) attributes {dimension_semantics = [#tpu.dimension_semantics<parallel>, #tpu.dimension_semantics<parallel>], iteration_bounds = array<i64: 2, 1>, scalar_prefetch = 0 : i64, scratch_operands = 0 : i64, tpu.core_type = #tpu.core_type<tc>, window_params = [{transform_indices = @transform_0, window_bounds = array<i64: 1, 16, 32>}, {pipeline_mode = #tpu.pipeline_mode<synchronous>, transform_indices = @transform_1, window_bounds = array<i64: 8, 16>}, {pipeline_mode = #tpu.pipeline_mode<synchronous>, transform_indices = @transform_2, window_bounds = array<i64: 8, 1>}, {transform_indices = @transform_3, window_bounds = array<i64: 1, 8, 32>}]} {
    %c0 = arith.constant 0 : index
    %c0_0 = arith.constant 0 : index
    %c0_1 = arith.constant 0 : index
    %0 = vector.load %arg2[%c0, %c0_0, %c0_1] : memref<1x16x32xf32, #tpu.memory_space<vmem>>, vector<1x16x32xf32>
    %1 = vector.shape_cast %0 : vector<1x16x32xf32> to vector<16x32xf32>
    %cst = arith.constant dense<0.000000e+00> : vector<32xf32>
    %2 = vector.multi_reduction <add>, %1, %cst [0] : vector<16x32xf32> to vector<32xf32>
    %3 = vector.shape_cast %2 : vector<32xf32> to vector<1x32xf32>
    %cst_2 = arith.constant 1.600000e+01 : f32
    %4 = vector.broadcast %cst_2 : f32 to vector<1x32xf32>
    %5 = arith.divf %3, %4 : vector<1x32xf32>
    %6 = vector.broadcast %5 : vector<1x32xf32> to vector<16x32xf32>
    %7 = arith.subf %1, %6 : vector<16x32xf32>
    %8 = arith.mulf %7, %7 : vector<16x32xf32>
    %cst_3 = arith.constant dense<0.000000e+00> : vector<32xf32>
    %9 = vector.multi_reduction <add>, %8, %cst_3 [0] : vector<16x32xf32> to vector<32xf32>
    %10 = vector.shape_cast %9 : vector<32xf32> to vector<1x32xf32>
    %cst_4 = arith.constant 0.0666666701 : f32
    %11 = vector.broadcast %cst_4 : f32 to vector<1x32xf32>
    %12 = arith.mulf %10, %11 : vector<1x32xf32>
    %13 = math.sqrt %12 : vector<1x32xf32>
    %cst_5 = arith.constant 9.99999997E-7 : f32
    %14 = vector.broadcast %cst_5 : f32 to vector<1x32xf32>
    %15 = arith.addf %13, %14 : vector<1x32xf32>
    %c0_6 = arith.constant 0 : index
    %c0_7 = arith.constant 0 : index
    %16 = vector.load %arg3[%c0_6, %c0_7] : memref<8x16xf32, #tpu.memory_space<vmem>>, vector<8x16xf32>
    %cst_8 = arith.constant dense<0.000000e+00> : vector<8x32xf32>
    %17 = tpu.matmul %16, %7, %cst_8 {dimension_numbers = #tpu.dot_dimension_numbers<[1], [0], [0], [1], [0, 0, 1, 1], [], []>} : vector<8x16xf32>, vector<16x32xf32>, vector<8x32xf32> -> vector<8x32xf32>
    %c0_9 = arith.constant 0 : index
    %c0_10 = arith.constant 0 : index
    %18 = vector.load %arg4[%c0_9, %c0_10] : memref<8x1xf32, #tpu.memory_space<vmem>>, vector<8x1xf32>
    %19 = vector.broadcast %18 : vector<8x1xf32> to vector<8x32xf32>
    %20 = vector.broadcast %15 : vector<1x32xf32> to vector<8x32xf32>
    %21 = arith.mulf %19, %20 : vector<8x32xf32>
    %22 = arith.addf %17, %21 : vector<8x32xf32>
    %23 = vector.broadcast %5 : vector<1x32xf32> to vector<8x32xf32>
    %24 = arith.addf %22, %23 : vector<8x32xf32>
    %c0_11 = arith.constant 0 : index
    %c0_12 = arith.constant 0 : index
    %c0_13 = arith.constant 0 : index
    %25 = vector.load %arg5[%c0_11, %c0_12, %c0_13] : memref<1x8x32xf32, #tpu.memory_space<vmem>>, vector<1x8x32xf32>
    %26 = vector.shape_cast %25 : vector<1x8x32xf32> to vector<8x32xf32>
    %27 = vector.shape_cast %24 : vector<8x32xf32> to vector<1x8x32xf32>
    tpu.vector_store %arg5[%c0_11, %c0_12, %c0_13], %27 {strides = array<i32>} : memref<1x8x32xf32, #tpu.memory_space<vmem>>, vector<1x8x32xf32>,
    return
  }
  func.func @transform_0(%arg0: i32, %arg1: i32) -> (i32, i32, i32) {
    %c0_i32 = arith.constant 0 : i32
    %c0_i32_0 = arith.constant 0 : i32
    return %arg0, %c0_i32, %arg1 : i32, i32, i32
  }
  func.func @transform_1(%arg0: i32, %arg1: i32) -> (i32, i32) {
    %c0_i32 = arith.constant 0 : i32
    %c0_i32_0 = arith.constant 0 : i32
    %c0_i32_1 = arith.constant 0 : i32
    return %c0_i32, %c0_i32_0 : i32, i32
  }
  func.func @transform_2(%arg0: i32, %arg1: i32) -> (i32, i32) {
    %c0_i32 = arith.constant 0 : i32
    %c0_i32_0 = arith.constant 0 : i32
    %c0_i32_1 = arith.constant 0 : i32
    return %c0_i32, %c0_i32_0 : i32, i32
  }
  func.func @transform_3(%arg0: i32, %arg1: i32) -> (i32, i32, i32) {
    %c0_i32 = arith.constant 0 : i32
    %c0_i32_0 = arith.constant 0 : i32
    return %arg0, %c0_i32, %arg1 : i32, i32, i32
  }
}

</mosaic_0001>

<bundles_post_ra>
// kernel: tpu_custom_call.1
= control target key start
LH: loop header
LB: loop body
LE: loop exit
PB: predicated region body
PF: predicated region fallthrough
CT: control target
= control target key end

     0   :  { %8 = vsyncpa [#allocation3], 0  ;;  %s744_s0 = inlined_call_operand.hbm [shape: f32[2,16,32], index: 0, kind: input, shape index: {}]   ;;  %s745_s1 = inlined_call_operand.vmem [shape: f32[8,16], index: 1, kind: input, shape index: {}]   ;;  %s746_s2 = inlined_call_operand.vmem [shape: f32[8,1], index: 2, kind: input, shape index: {}]   ;;  %s747_s3 = inlined_call_operand.hbm [shape: f32[2,8,32], index: 3, kind: output, shape index: {}]  }
   0x1   :  { %10 = vsyncpa [#allocation3 + $0x1], 0 }
   0x2   :  { %11 = vsyncpa [#allocation4], 0 }
   0x3   :  { %13 = vsyncpa [#allocation4 + $0x1], 0  ;;  %s612_s12 = smov 0   ;;  %s614_s13 = smov 0  }
   0x4   :  { %s616_s14 = smov 0   ;;  %s618_s15 = smov 0  }
   0x5   :  { %s620_s16 = smov 0   ;;  %s622_s17 = smov 0  }
   0x6 LB: > { %s387_s18 = sadd.s32 4294967295, %s586_s17   ;;  %s388_s19 = sadd.s32 4294967294, %s586_s17   ;;  %s586_s17 = sphi %s622_s17, %s19_s17   ;;  %s582_s16 = sphi %s620_s16, %s756_s16   ;;  %s578_s15 = sphi %s618_s15, %s755_s15   ;;  %s574_s14 = sphi %s616_s14, %s754_s14   ;;  %s570_s13 = sphi %s614_s13, %s753_s13   ;;  %s566_s12 = sphi %s612_s12, %s752_s12  }
   0x7   : > { %s31_s20 = sadd.s32 1, %s582_s16  ;;  %s40_s21 = sadd.s32 1, %s574_s14 }
   0x8   : > { %p33_p0 = scmp.ge.s32.totalorder %s31_s20, 2  ;;  %p47_p1 = scmp.ne.s32.totalorder %s574_s14, %s570_s13 }
   0x9   : > { %p48_p2 = scmp.eq.s32.totalorder %s586_s17, 0  ;;  %p53_p3 = scmp.ne.s32.totalorder %s570_s13, %s566_s12 }
   0xa   : > { %s758_s20 = smov (%p33_p0, %s31_s20), 0  ;;  %p54_p5 = scmp.eq.s32.totalorder %s387_s18, 0 }
   0xb   : > { %p653_p4 = por %p48_p2, %p47_p1  ;;  %s35_s23 = ssub.s32 %s582_s16, %s758_s20 }
   0xc   : > { %p121_p6 = scmp.eq.s32.totalorder %s387_s18, 1  ;;  %p38_p7 = scmp.eq.s32.totalorder %s35_s23, 0 }
   0xd   : > { %p659_p8 = por %p54_p5, %p53_p3  ;;  %p127_p10 = scmp.eq.s32.totalorder %s388_s19, 1 }
   0xe   : > { %p663_p9 = por %p121_p6, %p47_p1  ;;  %p390_p12 = scmp.ge.s32.totalorder %s586_s17, 2 }
   0xf   : > { %s668_s26 = scalar_select %p38_p7, %s574_s14, %s40_s21  }
  0x10   : > { %p670_p11 = por %p127_p10, %p53_p3  ;;  %p415_p13 = scmp.lt.s32.totalorder %s586_s17, 2 }
  0x11   : > { %s153_s28 = sand.u32 1, %s574_s14   ;;  %s402_s30 = sshll.u32 %s582_s16, 4 }
  0x12   : > { %s391_s29 = sshll.u32 %s153_s28, 4  ;;  %s163_s6 = scalar_lea.hbm %s744_s0, %s402_s30 }
  0x13   : > { %s157_s7 = scalar_lea.vmem [#allocation2], %s391_s29  ;;  %s164_s9 = sshll.u32 %s163_s6, 4  ;;  %s165_s9 = int_to_ptr.hbm [resolvable:$true] %s164_s9 }
  0x14   : > { %s166_s8 = sshll.u32 %s157_s7, 4  ;;  %p408_p0 = pnand %p415_p13, %p653_p4  ;;  %s167_s8 = int_to_ptr.vmem [resolvable:$true] %s166_s8 }
  0x15   : > { %p394_p1 = scmp.ge.s32.totalorder %s586_s17, 1  ;;  %s154_s10 = scalar_lea.sflag [#allocation3], %s153_s28 }
  0x16   : > { %s588_s11 = smov 128   ;;  %s589_s18 = smov 8  }
  0x17   : > { %410 = dma.hbm_to_vmem [thread:$0]  (!%p408_p0), %s165_s9, 256, %s167_s8, %s154_s10, %s588_s11, %s588_s11, %s589_s18  }
  0x18   : > { %p174_p2 = scmp.lt.s32.totalorder %s586_s17, 3 }
  0x1a   : > { %p175_p3 = pnand %p394_p1, %p174_p2 }
  0x1b   : > { %s686_s19 = sand.u32 (!%p175_p3), 1, %s570_s13  }
  0x1c   : > { %178 = sbr.rel (%p175_p3) target bundleno = 191 (0xbf), region = 32  ;;  %s395_s21 = sshll.u32 (!%p175_p3), %s686_s19, 4 }
  0x1d   : > { %s181_s23 = scalar_lea.sflag (!%p175_p3), [#allocation3], %s686_s19  ;;  %s184_s29 = scalar_lea.vmem (!%p175_p3), [#allocation2], %s395_s21 }
  0x21   : > { %557 = dma.done.wait (%p659_p8), %s181_s23, 256  }
  0x22   : > { %559 = vsyncadd (%p659_p8), %s181_s23, 4294967040  ;;  %v590_v0 = vmov 16.0   ;;  %vm210_vm0 = vcmask 261120   ;;  %v591_v1 = vmov 0   ;;  %v208_v3 = vld [vmem:[%s184_s29] sm:$0xff]  ;;  %v209_v4 = vld [vmem:[%s184_s29 + $0x8] sm:$0xff] }
  0x23   : > { %470 = vrcp.f32 %v590_v0  ;;  %469 = vset.pattern.permute.xlu0 %v591_v1  ;;  %v211_v5 = vsel %vm210_vm0, %v208_v3, 0.0  ;;  %v212_v6 = vsel %vm210_vm0, %v209_v4, 0.0  ;;  %v256_v8 = vld [vmem:[%s746_s2] sm:$0xff]  ;;  %vm263_vm2 = vcmask 130048   ;;  %s396_s4 = sshll.u32 %s686_s19, 3  ;;  %s399_s5 = sshll.u32 %s578_s15, 3 }
  0x24   : > { %v213_v9 = vadd.f32 %v212_v6, %v211_v5  ;;  %259 = vperm.xlu0 %469, %v256_v8   ;;  %v255_v25 = vld [vmem:[%s745_s1] sm:$0xff]  ;;  %s301_s8 = scalar_lea.hbm %s747_s3, %s399_s5  ;;  %s207_s9 = scalar_lea.vmem [#allocation5], %s396_s4 }
  0x25   : > { %s303_s10 = sshll.u32 %s207_s9, 4  ;;  %s305_s11 = sshll.u32 %s301_s8, 4  ;;  %s304_s10 = int_to_ptr.vmem [resolvable:$true] %s303_s10  ;;  %s306_s11 = int_to_ptr.hbm [resolvable:$true] %s305_s11 }
  0x26   : > { %v214_v11 = vrot.slane %v213_v9, 4  ;;  %s290_s18 = scalar_lea.sflag [#allocation4], %s686_s19  ;;  %s518_s21 = sshra.s32 %s306_s11, 4  ;;  %s519_s21 = int_to_ptr.hbm [resolvable:$true] %s518_s21 }
  0x27   : > { %s520_s15 = scalar_lea.hbm %s519_s21, 8  ;;  %s524_s22 = scalar_lea.hbm %s747_s3, 16 }
  0x28   : > { %v215_v13 = vadd.f32 %v214_v11, %v213_v9  ;;  %p521_p4 = scmp.ne.s32.totalorder %s519_s21, %s520_s15  ;;  %p525_p7 = scmp.lt.s32.totalorder %s519_s21, %s747_s3 }
  0x29   : > { %v471_v2 = vpop.eup %470  ;;  %p526_p8 = scmp.lt.s32.totalorder %s524_s22, %s520_s15 }
  0x2a   : > { %v221_v7 = vmul.f32 16.0, %v471_v2  ;;  %v216_v14 = vrot.slane %v215_v13, 2  ;;  %vm225_vm1 = vweird.f32 %v471_v2  ;;  %p522_p5 = pnand %p521_p4, %p663_p9 }
  0x2b   : > { %p527_p10 = por %p526_p8, %p525_p7 }
  0x2c   : > { %v222_v10 = vsub.f32 1.0, %v221_v7  ;;  %v217_v16 = vadd.f32 %v216_v14, %v215_v13  ;;  %p523_p6 = pneg %p522_p5 }
  0x2e   : > { %v223_v12 = vmul.f32 %v471_v2, %v222_v10  ;;  %v218_v17 = vrot.slane %v217_v16, 1  ;;  %p528_p13 = pnand %p527_p10, %p523_p6 }
  0x30   : > { %v224_v15 = vadd.f32 %v471_v2, %v223_v12  ;;  %v219_v19 = vadd.f32 %v218_v17, %v217_v16 }
  0x32   : > { %v226_v18 = vsel %vm225_vm1, %v471_v2, %v224_v15 }
  0x33   : > { %v227_v20 = vmul.f32 %v226_v18, %v219_v19 }
  0x35   : > { %v229_v21 = vsub.f32 %v209_v4, %v227_v20  ;;  %v228_v22 = vsub.f32 %v208_v3, %v227_v20 }
  0x37   : > { %v231_v23 = vmul.f32 %v229_v21, %v229_v21  ;;  %281 = vmatpush.msra.mxu0 %v229_v21  ;;  %v230_v24 = vmul.f32 %v228_v22, %v228_v22 }
  0x39   : > { %v233_v26 = vsel %vm210_vm0, %v231_v23, 0.0  ;;  %v232_v27 = vsel %vm210_vm0, %v230_v24, 0.0  ;;  %282 = vmatpush.msra.mxu0 %v228_v22 }
  0x3a   : > { %v234_v28 = vadd.f32 %v233_v26, %v232_v27  ;;  %397 = vmatmul.msk.f32.vlgmr.msra.gmra.mxu0 %vm263_vm2, %v255_v25 }
  0x3c   : > { %v235_v29 = vrot.slane %v234_v28, 4 }
  0x3e   : > { %v236_v30 = vadd.f32 %v235_v29, %v234_v28 }
  0x40   : > { %v237_v31 = vrot.slane %v236_v30, 2 }
  0x42   : > { %v238_v32 = vadd.f32 %v237_v31, %v236_v30 }
  0x44   : > { %v239_v33 = vrot.slane %v238_v32, 1 }
  0x46   : > { %v240_v34 = vadd.f32 %v239_v33, %v238_v32 }
  0x48   : > { %v241_v35 = vmul.f32 0.06666667, %v240_v34 }
  0x4a   : > { %472 = vrsqrt.f32 %v241_v35  ;;  %vm249_vm3 = vcmp.eq.f32.partialorder %v241_v35, inf  ;;  %v252_v43 = vand.u32 2147483648, %v241_v35  ;;  %vm251_vm4 = vcmp.eq.f32.partialorder %v241_v35, 0.0 }
  0x50   : > { %v473_v36 = vpop.eup %472 }
  0x51   : > { %v243_v37 = vmul.f32 %v473_v36, %v241_v35 }
  0x53   : > { %v244_v38 = vmul.f32 %v473_v36, %v243_v37 }
  0x55   : > { %v245_v39 = vmul.f32 0.5, %v244_v38 }
  0x57   : > { %v246_v40 = vsub.f32 1.5, %v245_v39 }
  0x59   : > { %v247_v41 = vmul.f32 %v473_v36, %v246_v40 }
  0x5b   : > { %v248_v42 = vmul.f32 %v247_v41, %v241_v35 }
  0x5d   : > { %v250_v44 = vsel %vm249_vm3, %v241_v35, %v248_v42 }
  0x5e   : > { %v253_v45 = vsel %vm251_vm4, %v252_v43, %v250_v44 }
  0x5f   : > { %v254_v46 = vadd.f32 1e-06, %v253_v45 }
  0x96   : > { %v260_v47 = vpop.permute.xlu0 %259 }
  0x97   : > { %v262_v48 = vmul.f32 %v260_v47, %v254_v46 }
  0xb7   : > { %v284_v49 = vpop.f32.mrf.mxu0 }
  0xb8   : > { %v285_v50 = vadd.f32 %v284_v49, %v262_v48 }
  0xba   : > { %v287_v51 = vadd.f32 %v285_v50, %v227_v20 }
  0xbc   : > { %288 = vst.msk [vmem:[%s207_s9] sm:$0xff] %vm210_vm0, %v287_v51 }
  0xbd   : > { %531 = shalt.err (!%p528_p13)
}
  0xbe   : > { %405 = dma.vmem_to_hbm [thread:$0]  (%p663_p9), %s304_s10, 128, %s306_s11, %s290_s18  }
  0xbf PF: > { %s317_s19 = sand.u32 1, %s566_s12   ;;  %p412_p0 = pnand %p390_p12, %p670_p11 }
  0xc0   : > { %s318_s30 = scalar_lea.sflag [#allocation4], %s317_s19 }
  0xc1   : > { %p413_p1 = pneg %p412_p0 }
  0xc3   : > { %561 = dma.done.wait (%p413_p1), %s318_s30, 128  }
  0xc4   : > { %563 = vsyncadd (%p413_p1), %s318_s30, 4294967168  ;;  %s19_s17 = sadd.s32 1, %s586_s17   ;;  %s752_s12 = smov %s570_s13 }
  0xc5   : > { %p16_p2 = scmp.ge.s32.totalorder %s19_s17, 4   ;;  %s753_s13 = smov %s574_s14 }
  0xc6   : > { %s754_s14 = smov %s668_s26  ;;  %s755_s15 = smov %s582_s16 }
  0xc7   : > { %s756_s16 = smov %s758_s20  ;;  %18 = sbr.rel (!%p16_p2) target bundleno = 6 (0x6), region = 77 }
  0xcc   :  { %324 = vsyncpa [#allocation3], 1 }
  0xcd   :  { %326 = vsyncpa [#allocation3 + $0x1], 1 }
  0xce   :  { %327 = vsyncpa [#allocation4], 1 }
  0xcf   :  { %329 = vsyncpa [#allocation4 + $0x1], 1 }

</bundles_post_ra>
